<compile_context>
chip_gen: v7x
topology: tpu7x:2x2x1
jax: 0.10.0
libtpu: 0.0.40
codegen_flags: <defaults>
</compile_context>

<pallas_src>
import jax
import jax.numpy as jnp
from jax.experimental import pallas as pl
from jax.experimental.pallas import tpu as pltpu

BN_EPS = 1e-5
NUM_BN_LAYERS = 6
LANES = 128  # padded feature / output width (lane axis)


def iknet_kernel(x_ref, w_ref, gb_ref, out_ref):
    """Whole IKNet MLP in one kernel invocation (everything resident in VMEM).

    x_ref  : (B, 128) f32   input features zero-padded to 128 lanes
    w_ref  : (7, 128, 128) bf16  Linear weights, (in, out), zero-padded
    gb_ref : (7, 2, 128) f32     [i,0]=gamma_i, [i,1]=beta_i for i<6;
                                 [6,0]=final Linear bias, [6,1]=unused
    out_ref: (B, 128) f32   lane-dense output (cols >= out_dim are padding)
    """
    h = x_ref[...]  # f32 activations

    for i in range(NUM_BN_LAYERS):
        # Linear (bias dropped: it cancels with train-mode BN batch mean).
        z = jnp.dot(h.astype(jnp.bfloat16), w_ref[i],
                    preferred_element_type=jnp.float32)
        # Train-mode BatchNorm1d: batch mean + biased batch variance (f32).
        mean = jnp.mean(z, axis=0, keepdims=True)
        var = jnp.mean(jnp.square(z - mean), axis=0, keepdims=True)
        gb = gb_ref[i]                                   # (2, 128) f32
        scale = gb[0:1, :] * jax.lax.rsqrt(var + BN_EPS)  # (1, 128)
        shift = gb[1:2, :] - mean * scale                 # (1, 128)
        # Folded BN-affine + Sigmoid: one fused mul-add on the (B,128) tile.
        h = jax.nn.sigmoid(z * scale + shift)

    # Final Linear (with bias), lane-dense (padded to 128) store.
    out = jnp.dot(h.astype(jnp.bfloat16), w_ref[NUM_BN_LAYERS],
                  preferred_element_type=jnp.float32)
    gb6 = gb_ref[NUM_BN_LAYERS]
    out_ref[...] = out + gb6[0:1, :]


def init_iknet_params(key, inc, width, joints):
    """Deterministic parameter init mirroring the PyTorch module's shapes."""
    params = {}
    dims = [(inc, width)] + [(width, width)] * (NUM_BN_LAYERS - 1)
    for i, (fan_in, fan_out) in enumerate(dims):
        key, kw, kb, kg, kbeta = jax.random.split(key, 5)
        bound = 1.0 / jnp.sqrt(fan_in)
        # stored as (in, out)  (PyTorch Linear weight is (out, in))
        params[f"w{i}"] = jax.random.uniform(
            kw, (fan_in, fan_out), jnp.float32, -bound, bound)
        # Linear bias exists in the PyTorch module but is a no-op before
        # train-mode BN; created for fidelity, dropped at packing time.
        params[f"b{i}"] = jax.random.uniform(
            kb, (1, fan_out), jnp.float32, -bound, bound)
        params[f"g{i}"] = 1.0 + 0.1 * jax.random.normal(kg, (1, fan_out), jnp.float32)
        params[f"beta{i}"] = 0.1 * jax.random.normal(kbeta, (1, fan_out), jnp.float32)

    out_dim = joints * 6 + 1
    key, kw, kb = jax.random.split(key, 3)
    bound = 1.0 / jnp.sqrt(width)
    params["w6"] = jax.random.uniform(kw, (width, out_dim), jnp.float32, -bound, bound)
    params["b6"] = jax.random.uniform(kb, (1, out_dim), jnp.float32, -bound, bound)
    return params


def pack_iknet_params(params, inc, width, joints):
    """Pack the per-layer params into two lane-aligned slabs."""
    out_dim = joints * 6 + 1
    assert inc <= LANES and width <= LANES and out_dim <= LANES

    w_slab = jnp.zeros((NUM_BN_LAYERS + 1, LANES, LANES), jnp.float32)
    gb_slab = jnp.zeros((NUM_BN_LAYERS + 1, 2, LANES), jnp.float32)

    for i in range(NUM_BN_LAYERS):
        w = params[f"w{i}"]                        # (fan_in, fan_out)
        fi, fo = w.shape
        w_slab = w_slab.at[i, :fi, :fo].set(w)
        gb_slab = gb_slab.at[i, 0, :fo].set(params[f"g{i}"][0])
        gb_slab = gb_slab.at[i, 1, :fo].set(params[f"beta{i}"][0])
        # b{i} intentionally not packed: cancels with BN batch mean.

    w6 = params["w6"]                              # (width, out_dim)
    w_slab = w_slab.at[NUM_BN_LAYERS, :width, :out_dim].set(w6)
    gb_slab = gb_slab.at[NUM_BN_LAYERS, 0, :out_dim].set(params["b6"][0])

    return w_slab.astype(jnp.bfloat16), gb_slab, out_dim


def iknet_forward(x, w_slab, gb_slab, out_dim):
    """x: (B, J, 3) -> (theta_raw (B, joints, 6), shape (B,))."""
    B, J, C = x.shape
    assert C == 3
    inc = J * C
    assert inc <= LANES

    x_flat = x.reshape(B, inc)                     # 'b j c -> b (j c)'
    x_pad = jnp.pad(x_flat, ((0, 0), (0, LANES - inc)))  # lane-align input

    out = pl.pallas_call(
        iknet_kernel,
        out_shape=jax.ShapeDtypeStruct((B, LANES), jnp.float32),
        in_specs=[pl.BlockSpec(memory_space=pltpu.MemorySpace.VMEM)] * 3,
        out_specs=pl.BlockSpec(memory_space=pltpu.MemorySpace.VMEM),
    )(x_pad, w_slab, gb_slab)

    out = out[:, :out_dim]
    joints = (out_dim - 1) // 6
    theta_raw = out[:, :-1].reshape(B, joints, 6)  # 'b (j n) -> b j n', n=6
    shape = out[:, -1]
    return theta_raw, shape


if __name__ == "__main__":
    # Small shapes consistent with the module: joints=16 -> inc = 16*3 = 48
    B, JOINTS, WIDTH = 2, 16, 32
    INC = JOINTS * 3

    key = jax.random.PRNGKey(0)
    key, kx = jax.random.split(key)
    x = jax.random.normal(kx, (B, JOINTS, 3), jnp.float32)

    params = init_iknet_params(key, INC, WIDTH, JOINTS)
    w_slab, gb_slab, out_dim = pack_iknet_params(params, INC, WIDTH, JOINTS)

    theta_raw, shape = iknet_forward(x, w_slab, gb_slab, out_dim)
    jax.block_until_ready((theta_raw, shape))

    assert theta_raw.shape == (B, JOINTS, 6)
    assert shape.shape == (B,)
    assert bool(jnp.all(jnp.isfinite(theta_raw)))
    assert bool(jnp.all(jnp.isfinite(shape)))
    print("KERNEL_OK")
</pallas_src>

<mosaic_0001>
module attributes {stable_mosaic.version = 11 : i64} {
  func.func @iknet_kernel(%arg0: memref<2x128xf32, #tpu.memory_space<vmem>>, %arg1: memref<7x128x128xbf16, #tpu.memory_space<vmem>>, %arg2: memref<7x2x128xf32, #tpu.memory_space<vmem>>, %arg3: memref<2x128xf32, #tpu.memory_space<vmem>>) attributes {dimension_semantics = [], scalar_prefetch = 0 : i64, scratch_operands = 0 : i64, tpu.core_type = #tpu.core_type<tc>} {
    %c0 = arith.constant 0 : index
    %c0_0 = arith.constant 0 : index
    %0 = vector.load %arg0[%c0, %c0_0] : memref<2x128xf32, #tpu.memory_space<vmem>>, vector<2x128xf32>
    %1 = arith.truncf %0 : vector<2x128xf32> to vector<2x128xbf16>
    %c0_1 = arith.constant 0 : index
    %c0_2 = arith.constant 0 : index
    %c0_3 = arith.constant 0 : index
    %2 = vector.load %arg1[%c0_1, %c0_2, %c0_3] : memref<7x128x128xbf16, #tpu.memory_space<vmem>>, vector<1x128x128xbf16>
    %3 = vector.shape_cast %2 : vector<1x128x128xbf16> to vector<128x128xbf16>
    %cst = arith.constant dense<0.000000e+00> : vector<2x128xf32>
    %4 = tpu.matmul %1, %3, %cst {dimension_numbers = #tpu.dot_dimension_numbers<[1], [0], [0], [1], [0, 0, 1, 1], [], []>} : vector<2x128xbf16>, vector<128x128xbf16>, vector<2x128xf32> -> vector<2x128xf32>
    %cst_4 = arith.constant dense<0.000000e+00> : vector<128xf32>
    %5 = vector.multi_reduction <add>, %4, %cst_4 [0] : vector<2x128xf32> to vector<128xf32>
    %6 = vector.shape_cast %5 : vector<128xf32> to vector<1x128xf32>
    %cst_5 = arith.constant 2.000000e+00 : f32
    %7 = vector.broadcast %cst_5 : f32 to vector<1x128xf32>
    %8 = arith.divf %6, %7 : vector<1x128xf32>
    %9 = vector.broadcast %8 : vector<1x128xf32> to vector<2x128xf32>
    %10 = arith.subf %4, %9 : vector<2x128xf32>
    %11 = arith.mulf %10, %10 : vector<2x128xf32>
    %cst_6 = arith.constant dense<0.000000e+00> : vector<128xf32>
    %12 = vector.multi_reduction <add>, %11, %cst_6 [0] : vector<2x128xf32> to vector<128xf32>
    %13 = vector.shape_cast %12 : vector<128xf32> to vector<1x128xf32>
    %cst_7 = arith.constant 2.000000e+00 : f32
    %14 = vector.broadcast %cst_7 : f32 to vector<1x128xf32>
    %15 = arith.divf %13, %14 : vector<1x128xf32>
    %c0_8 = arith.constant 0 : index
    %c0_9 = arith.constant 0 : index
    %c0_10 = arith.constant 0 : index
    %16 = vector.load %arg2[%c0_8, %c0_9, %c0_10] : memref<7x2x128xf32, #tpu.memory_space<vmem>>, vector<1x2x128xf32>
    %17 = vector.shape_cast %16 : vector<1x2x128xf32> to vector<2x128xf32>
    %18 = vector.extract_strided_slice %17 {offsets = [0, 0], sizes = [1, 128], strides = [1, 1]} : vector<2x128xf32> to vector<1x128xf32>
    %cst_11 = arith.constant 9.99999974E-6 : f32
    %19 = vector.broadcast %cst_11 : f32 to vector<1x128xf32>
    %20 = arith.addf %15, %19 : vector<1x128xf32>
    %21 = math.rsqrt %20 : vector<1x128xf32>
    %22 = arith.mulf %18, %21 : vector<1x128xf32>
    %23 = vector.extract_strided_slice %17 {offsets = [1, 0], sizes = [1, 128], strides = [1, 1]} : vector<2x128xf32> to vector<1x128xf32>
    %24 = arith.mulf %8, %22 : vector<1x128xf32>
    %25 = arith.subf %23, %24 : vector<1x128xf32>
    %26 = vector.broadcast %22 : vector<1x128xf32> to vector<2x128xf32>
    %27 = arith.mulf %4, %26 : vector<2x128xf32>
    %28 = vector.broadcast %25 : vector<1x128xf32> to vector<2x128xf32>
    %29 = arith.addf %27, %28 : vector<2x128xf32>
    %30 = arith.negf %29 : vector<2x128xf32>
    %31 = math.exp %30 : vector<2x128xf32>
    %cst_12 = arith.constant 1.000000e+00 : f32
    %32 = vector.broadcast %cst_12 : f32 to vector<2x128xf32>
    %33 = arith.addf %32, %31 : vector<2x128xf32>
    %34 = arith.divf %32, %33 : vector<2x128xf32>
    %35 = arith.truncf %34 : vector<2x128xf32> to vector<2x128xbf16>
    %c1 = arith.constant 1 : index
    %c0_13 = arith.constant 0 : index
    %c0_14 = arith.constant 0 : index
    %36 = vector.load %arg1[%c1, %c0_13, %c0_14] : memref<7x128x128xbf16, #tpu.memory_space<vmem>>, vector<1x128x128xbf16>
    %37 = vector.shape_cast %36 : vector<1x128x128xbf16> to vector<128x128xbf16>
    %cst_15 = arith.constant dense<0.000000e+00> : vector<2x128xf32>
    %38 = tpu.matmul %35, %37, %cst_15 {dimension_numbers = #tpu.dot_dimension_numbers<[1], [0], [0], [1], [0, 0, 1, 1], [], []>} : vector<2x128xbf16>, vector<128x128xbf16>, vector<2x128xf32> -> vector<2x128xf32>
    %cst_16 = arith.constant dense<0.000000e+00> : vector<128xf32>
    %39 = vector.multi_reduction <add>, %38, %cst_16 [0] : vector<2x128xf32> to vector<128xf32>
    %40 = vector.shape_cast %39 : vector<128xf32> to vector<1x128xf32>
    %cst_17 = arith.constant 2.000000e+00 : f32
    %41 = vector.broadcast %cst_17 : f32 to vector<1x128xf32>
    %42 = arith.divf %40, %41 : vector<1x128xf32>
    %43 = vector.broadcast %42 : vector<1x128xf32> to vector<2x128xf32>
    %44 = arith.subf %38, %43 : vector<2x128xf32>
    %45 = arith.mulf %44, %44 : vector<2x128xf32>
    %cst_18 = arith.constant dense<0.000000e+00> : vector<128xf32>
    %46 = vector.multi_reduction <add>, %45, %cst_18 [0] : vector<2x128xf32> to vector<128xf32>
    %47 = vector.shape_cast %46 : vector<128xf32> to vector<1x128xf32>
    %cst_19 = arith.constant 2.000000e+00 : f32
    %48 = vector.broadcast %cst_19 : f32 to vector<1x128xf32>
    %49 = arith.divf %47, %48 : vector<1x128xf32>
    %c1_20 = arith.constant 1 : index
    %c0_21 = arith.constant 0 : index
    %c0_22 = arith.constant 0 : index
    %50 = vector.load %arg2[%c1_20, %c0_21, %c0_22] : memref<7x2x128xf32, #tpu.memory_space<vmem>>, vector<1x2x128xf32>
    %51 = vector.shape_cast %50 : vector<1x2x128xf32> to vector<2x128xf32>
    %52 = vector.extract_strided_slice %51 {offsets = [0, 0], sizes = [1, 128], strides = [1, 1]} : vector<2x128xf32> to vector<1x128xf32>
    %cst_23 = arith.constant 9.99999974E-6 : f32
    %53 = vector.broadcast %cst_23 : f32 to vector<1x128xf32>
    %54 = arith.addf %49, %53 : vector<1x128xf32>
    %55 = math.rsqrt %54 : vector<1x128xf32>
    %56 = arith.mulf %52, %55 : vector<1x128xf32>
    %57 = vector.extract_strided_slice %51 {offsets = [1, 0], sizes = [1, 128], strides = [1, 1]} : vector<2x128xf32> to vector<1x128xf32>
    %58 = arith.mulf %42, %56 : vector<1x128xf32>
    %59 = arith.subf %57, %58 : vector<1x128xf32>
    %60 = vector.broadcast %56 : vector<1x128xf32> to vector<2x128xf32>
    %61 = arith.mulf %38, %60 : vector<2x128xf32>
    %62 = vector.broadcast %59 : vector<1x128xf32> to vector<2x128xf32>
    %63 = arith.addf %61, %62 : vector<2x128xf32>
    %64 = arith.negf %63 : vector<2x128xf32>
    %65 = math.exp %64 : vector<2x128xf32>
    %cst_24 = arith.constant 1.000000e+00 : f32
    %66 = vector.broadcast %cst_24 : f32 to vector<2x128xf32>
    %67 = arith.addf %66, %65 : vector<2x128xf32>
    %68 = arith.divf %66, %67 : vector<2x128xf32>
    %69 = arith.truncf %68 : vector<2x128xf32> to vector<2x128xbf16>
    %c2 = arith.constant 2 : index
    %c0_25 = arith.constant 0 : index
    %c0_26 = arith.constant 0 : index
    %70 = vector.load %arg1[%c2, %c0_25, %c0_26] : memref<7x128x128xbf16, #tpu.memory_space<vmem>>, vector<1x128x128xbf16>
    %71 = vector.shape_cast %70 : vector<1x128x128xbf16> to vector<128x128xbf16>
    %cst_27 = arith.constant dense<0.000000e+00> : vector<2x128xf32>
    %72 = tpu.matmul %69, %71, %cst_27 {dimension_numbers = #tpu.dot_dimension_numbers<[1], [0], [0], [1], [0, 0, 1, 1], [], []>} : vector<2x128xbf16>, vector<128x128xbf16>, vector<2x128xf32> -> vector<2x128xf32>
    %cst_28 = arith.constant dense<0.000000e+00> : vector<128xf32>
    %73 = vector.multi_reduction <add>, %72, %cst_28 [0] : vector<2x128xf32> to vector<128xf32>
    %74 = vector.shape_cast %73 : vector<128xf32> to vector<1x128xf32>
    %cst_29 = arith.constant 2.000000e+00 : f32
    %75 = vector.broadcast %cst_29 : f32 to vector<1x128xf32>
    %76 = arith.divf %74, %75 : vector<1x128xf32>
    %77 = vector.broadcast %76 : vector<1x128xf32> to vector<2x128xf32>
    %78 = arith.subf %72, %77 : vector<2x128xf32>
    %79 = arith.mulf %78, %78 : vector<2x128xf32>
    %cst_30 = arith.constant dense<0.000000e+00> : vector<128xf32>
    %80 = vector.multi_reduction <add>, %79, %cst_30 [0] : vector<2x128xf32> to vector<128xf32>
    %81 = vector.shape_cast %80 : vector<128xf32> to vector<1x128xf32>
    %cst_31 = arith.constant 2.000000e+00 : f32
    %82 = vector.broadcast %cst_31 : f32 to vector<1x128xf32>
    %83 = arith.divf %81, %82 : vector<1x128xf32>
    %c2_32 = arith.constant 2 : index
    %c0_33 = arith.constant 0 : index
    %c0_34 = arith.constant 0 : index
    %84 = vector.load %arg2[%c2_32, %c0_33, %c0_34] : memref<7x2x128xf32, #tpu.memory_space<vmem>>, vector<1x2x128xf32>
    %85 = vector.shape_cast %84 : vector<1x2x128xf32> to vector<2x128xf32>
    %86 = vector.extract_strided_slice %85 {offsets = [0, 0], sizes = [1, 128], strides = [1, 1]} : vector<2x128xf32> to vector<1x128xf32>
    %cst_35 = arith.constant 9.99999974E-6 : f32
    %87 = vector.broadcast %cst_35 : f32 to vector<1x128xf32>
    %88 = arith.addf %83, %87 : vector<1x128xf32>
    %89 = math.rsqrt %88 : vector<1x128xf32>
    %90 = arith.mulf %86, %89 : vector<1x128xf32>
    %91 = vector.extract_strided_slice %85 {offsets = [1, 0], sizes = [1, 128], strides = [1, 1]} : vector<2x128xf32> to vector<1x128xf32>
    %92 = arith.mulf %76, %90 : vector<1x128xf32>
    %93 = arith.subf %91, %92 : vector<1x128xf32>
    %94 = vector.broadcast %90 : vector<1x128xf32> to vector<2x128xf32>
    %95 = arith.mulf %72, %94 : vector<2x128xf32>
    %96 = vector.broadcast %93 : vector<1x128xf32> to vector<2x128xf32>
    %97 = arith.addf %95, %96 : vector<2x128xf32>
    %98 = arith.negf %97 : vector<2x128xf32>
    %99 = math.exp %98 : vector<2x128xf32>
    %cst_36 = arith.constant 1.000000e+00 : f32
    %100 = vector.broadcast %cst_36 : f32 to vector<2x128xf32>
    %101 = arith.addf %100, %99 : vector<2x128xf32>
    %102 = arith.divf %100, %101 : vector<2x128xf32>
    %103 = arith.truncf %102 : vector<2x128xf32> to vector<2x128xbf16>
    %c3 = arith.constant 3 : index
    %c0_37 = arith.constant 0 : index
    %c0_38 = arith.constant 0 : index
    %104 = vector.load %arg1[%c3, %c0_37, %c0_38] : memref<7x128x128xbf16, #tpu.memory_space<vmem>>, vector<1x128x128xbf16>
    %105 = vector.shape_cast %104 : vector<1x128x128xbf16> to vector<128x128xbf16>
    %cst_39 = arith.constant dense<0.000000e+00> : vector<2x128xf32>
    %106 = tpu.matmul %103, %105, %cst_39 {dimension_numbers = #tpu.dot_dimension_numbers<[1], [0], [0], [1], [0, 0, 1, 1], [], []>} : vector<2x128xbf16>, vector<128x128xbf16>, vector<2x128xf32> -> vector<2x128xf32>
    %cst_40 = arith.constant dense<0.000000e+00> : vector<128xf32>
    %107 = vector.multi_reduction <add>, %106, %cst_40 [0] : vector<2x128xf32> to vector<128xf32>
    %108 = vector.shape_cast %107 : vector<128xf32> to vector<1x128xf32>
    %cst_41 = arith.constant 2.000000e+00 : f32
    %109 = vector.broadcast %cst_41 : f32 to vector<1x128xf32>
    %110 = arith.divf %108, %109 : vector<1x128xf32>
    %111 = vector.broadcast %110 : vector<1x128xf32> to vector<2x128xf32>
    %112 = arith.subf %106, %111 : vector<2x128xf32>
    %113 = arith.mulf %112, %112 : vector<2x128xf32>
    %cst_42 = arith.constant dense<0.000000e+00> : vector<128xf32>
    %114 = vector.multi_reduction <add>, %113, %cst_42 [0] : vector<2x128xf32> to vector<128xf32>
    %115 = vector.shape_cast %114 : vector<128xf32> to vector<1x128xf32>
    %cst_43 = arith.constant 2.000000e+00 : f32
    %116 = vector.broadcast %cst_43 : f32 to vector<1x128xf32>
    %117 = arith.divf %115, %116 : vector<1x128xf32>
    %c3_44 = arith.constant 3 : index
    %c0_45 = arith.constant 0 : index
    %c0_46 = arith.constant 0 : index
    %118 = vector.load %arg2[%c3_44, %c0_45, %c0_46] : memref<7x2x128xf32, #tpu.memory_space<vmem>>, vector<1x2x128xf32>
    %119 = vector.shape_cast %118 : vector<1x2x128xf32> to vector<2x128xf32>
    %120 = vector.extract_strided_slice %119 {offsets = [0, 0], sizes = [1, 128], strides = [1, 1]} : vector<2x128xf32> to vector<1x128xf32>
    %cst_47 = arith.constant 9.99999974E-6 : f32
    %121 = vector.broadcast %cst_47 : f32 to vector<1x128xf32>
    %122 = arith.addf %117, %121 : vector<1x128xf32>
    %123 = math.rsqrt %122 : vector<1x128xf32>
    %124 = arith.mulf %120, %123 : vector<1x128xf32>
    %125 = vector.extract_strided_slice %119 {offsets = [1, 0], sizes = [1, 128], strides = [1, 1]} : vector<2x128xf32> to vector<1x128xf32>
    %126 = arith.mulf %110, %124 : vector<1x128xf32>
    %127 = arith.subf %125, %126 : vector<1x128xf32>
    %128 = vector.broadcast %124 : vector<1x128xf32> to vector<2x128xf32>
    %129 = arith.mulf %106, %128 : vector<2x128xf32>
    %130 = vector.broadcast %127 : vector<1x128xf32> to vector<2x128xf32>
    %131 = arith.addf %129, %130 : vector<2x128xf32>
    %132 = arith.negf %131 : vector<2x128xf32>
    %133 = math.exp %132 : vector<2x128xf32>
    %cst_48 = arith.constant 1.000000e+00 : f32
    %134 = vector.broadcast %cst_48 : f32 to vector<2x128xf32>
    %135 = arith.addf %134, %133 : vector<2x128xf32>
    %136 = arith.divf %134, %135 : vector<2x128xf32>
    %137 = arith.truncf %136 : vector<2x128xf32> to vector<2x128xbf16>
    %c4 = arith.constant 4 : index
    %c0_49 = arith.constant 0 : index
    %c0_50 = arith.constant 0 : index
    %138 = vector.load %arg1[%c4, %c0_49, %c0_50] : memref<7x128x128xbf16, #tpu.memory_space<vmem>>, vector<1x128x128xbf16>
    %139 = vector.shape_cast %138 : vector<1x128x128xbf16> to vector<128x128xbf16>
    %cst_51 = arith.constant dense<0.000000e+00> : vector<2x128xf32>
    %140 = tpu.matmul %137, %139, %cst_51 {dimension_numbers = #tpu.dot_dimension_numbers<[1], [0], [0], [1], [0, 0, 1, 1], [], []>} : vector<2x128xbf16>, vector<128x128xbf16>, vector<2x128xf32> -> vector<2x128xf32>
    %cst_52 = arith.constant dense<0.000000e+00> : vector<128xf32>
    %141 = vector.multi_reduction <add>, %140, %cst_52 [0] : vector<2x128xf32> to vector<128xf32>
    %142 = vector.shape_cast %141 : vector<128xf32> to vector<1x128xf32>
    %cst_53 = arith.constant 2.000000e+00 : f32
    %143 = vector.broadcast %cst_53 : f32 to vector<1x128xf32>
    %144 = arith.divf %142, %143 : vector<1x128xf32>
    %145 = vector.broadcast %144 : vector<1x128xf32> to vector<2x128xf32>
    %146 = arith.subf %140, %145 : vector<2x128xf32>
    %147 = arith.mulf %146, %146 : vector<2x128xf32>
    %cst_54 = arith.constant dense<0.000000e+00> : vector<128xf32>
    %148 = vector.multi_reduction <add>, %147, %cst_54 [0] : vector<2x128xf32> to vector<128xf32>
    %149 = vector.shape_cast %148 : vector<128xf32> to vector<1x128xf32>
    %cst_55 = arith.constant 2.000000e+00 : f32
    %150 = vector.broadcast %cst_55 : f32 to vector<1x128xf32>
    %151 = arith.divf %149, %150 : vector<1x128xf32>
    %c4_56 = arith.constant 4 : index
    %c0_57 = arith.constant 0 : index
    %c0_58 = arith.constant 0 : index
    %152 = vector.load %arg2[%c4_56, %c0_57, %c0_58] : memref<7x2x128xf32, #tpu.memory_space<vmem>>, vector<1x2x128xf32>
    %153 = vector.shape_cast %152 : vector<1x2x128xf32> to vector<2x128xf32>
    %154 = vector.extract_strided_slice %153 {offsets = [0, 0], sizes = [1, 128], strides = [1, 1]} : vector<2x128xf32> to vector<1x128xf32>
    %cst_59 = arith.constant 9.99999974E-6 : f32
    %155 = vector.broadcast %cst_59 : f32 to vector<1x128xf32>
    %156 = arith.addf %151, %155 : vector<1x128xf32>
    %157 = math.rsqrt %156 : vector<1x128xf32>
    %158 = arith.mulf %154, %157 : vector<1x128xf32>
    %159 = vector.extract_strided_slice %153 {offsets = [1, 0], sizes = [1, 128], strides = [1, 1]} : vector<2x128xf32> to vector<1x128xf32>
    %160 = arith.mulf %144, %158 : vector<1x128xf32>
    %161 = arith.subf %159, %160 : vector<1x128xf32>
    %162 = vector.broadcast %158 : vector<1x128xf32> to vector<2x128xf32>
    %163 = arith.mulf %140, %162 : vector<2x128xf32>
    %164 = vector.broadcast %161 : vector<1x128xf32> to vector<2x128xf32>
    %165 = arith.addf %163, %164 : vector<2x128xf32>
    %166 = arith.negf %165 : vector<2x128xf32>
    %167 = math.exp %166 : vector<2x128xf32>
    %cst_60 = arith.constant 1.000000e+00 : f32
    %168 = vector.broadcast %cst_60 : f32 to vector<2x128xf32>
    %169 = arith.addf %168, %167 : vector<2x128xf32>
    %170 = arith.divf %168, %169 : vector<2x128xf32>
    %171 = arith.truncf %170 : vector<2x128xf32> to vector<2x128xbf16>
    %c5 = arith.constant 5 : index
    %c0_61 = arith.constant 0 : index
    %c0_62 = arith.constant 0 : index
    %172 = vector.load %arg1[%c5, %c0_61, %c0_62] : memref<7x128x128xbf16, #tpu.memory_space<vmem>>, vector<1x128x128xbf16>
    %173 = vector.shape_cast %172 : vector<1x128x128xbf16> to vector<128x128xbf16>
    %cst_63 = arith.constant dense<0.000000e+00> : vector<2x128xf32>
    %174 = tpu.matmul %171, %173, %cst_63 {dimension_numbers = #tpu.dot_dimension_numbers<[1], [0], [0], [1], [0, 0, 1, 1], [], []>} : vector<2x128xbf16>, vector<128x128xbf16>, vector<2x128xf32> -> vector<2x128xf32>
    %cst_64 = arith.constant dense<0.000000e+00> : vector<128xf32>
    %175 = vector.multi_reduction <add>, %174, %cst_64 [0] : vector<2x128xf32> to vector<128xf32>
    %176 = vector.shape_cast %175 : vector<128xf32> to vector<1x128xf32>
    %cst_65 = arith.constant 2.000000e+00 : f32
    %177 = vector.broadcast %cst_65 : f32 to vector<1x128xf32>
    %178 = arith.divf %176, %177 : vector<1x128xf32>
    %179 = vector.broadcast %178 : vector<1x128xf32> to vector<2x128xf32>
    %180 = arith.subf %174, %179 : vector<2x128xf32>
    %181 = arith.mulf %180, %180 : vector<2x128xf32>
    %cst_66 = arith.constant dense<0.000000e+00> : vector<128xf32>
    %182 = vector.multi_reduction <add>, %181, %cst_66 [0] : vector<2x128xf32> to vector<128xf32>
    %183 = vector.shape_cast %182 : vector<128xf32> to vector<1x128xf32>
    %cst_67 = arith.constant 2.000000e+00 : f32
    %184 = vector.broadcast %cst_67 : f32 to vector<1x128xf32>
    %185 = arith.divf %183, %184 : vector<1x128xf32>
    %c5_68 = arith.constant 5 : index
    %c0_69 = arith.constant 0 : index
    %c0_70 = arith.constant 0 : index
    %186 = vector.load %arg2[%c5_68, %c0_69, %c0_70] : memref<7x2x128xf32, #tpu.memory_space<vmem>>, vector<1x2x128xf32>
    %187 = vector.shape_cast %186 : vector<1x2x128xf32> to vector<2x128xf32>
    %188 = vector.extract_strided_slice %187 {offsets = [0, 0], sizes = [1, 128], strides = [1, 1]} : vector<2x128xf32> to vector<1x128xf32>
    %cst_71 = arith.constant 9.99999974E-6 : f32
    %189 = vector.broadcast %cst_71 : f32 to vector<1x128xf32>
    %190 = arith.addf %185, %189 : vector<1x128xf32>
    %191 = math.rsqrt %190 : vector<1x128xf32>
    %192 = arith.mulf %188, %191 : vector<1x128xf32>
    %193 = vector.extract_strided_slice %187 {offsets = [1, 0], sizes = [1, 128], strides = [1, 1]} : vector<2x128xf32> to vector<1x128xf32>
    %194 = arith.mulf %178, %192 : vector<1x128xf32>
    %195 = arith.subf %193, %194 : vector<1x128xf32>
    %196 = vector.broadcast %192 : vector<1x128xf32> to vector<2x128xf32>
    %197 = arith.mulf %174, %196 : vector<2x128xf32>
    %198 = vector.broadcast %195 : vector<1x128xf32> to vector<2x128xf32>
    %199 = arith.addf %197, %198 : vector<2x128xf32>
    %200 = arith.negf %199 : vector<2x128xf32>
    %201 = math.exp %200 : vector<2x128xf32>
    %cst_72 = arith.constant 1.000000e+00 : f32
    %202 = vector.broadcast %cst_72 : f32 to vector<2x128xf32>
    %203 = arith.addf %202, %201 : vector<2x128xf32>
    %204 = arith.divf %202, %203 : vector<2x128xf32>
    %205 = arith.truncf %204 : vector<2x128xf32> to vector<2x128xbf16>
    %c6 = arith.constant 6 : index
    %c0_73 = arith.constant 0 : index
    %c0_74 = arith.constant 0 : index
    %206 = vector.load %arg1[%c6, %c0_73, %c0_74] : memref<7x128x128xbf16, #tpu.memory_space<vmem>>, vector<1x128x128xbf16>
    %207 = vector.shape_cast %206 : vector<1x128x128xbf16> to vector<128x128xbf16>
    %cst_75 = arith.constant dense<0.000000e+00> : vector<2x128xf32>
    %208 = tpu.matmul %205, %207, %cst_75 {dimension_numbers = #tpu.dot_dimension_numbers<[1], [0], [0], [1], [0, 0, 1, 1], [], []>} : vector<2x128xbf16>, vector<128x128xbf16>, vector<2x128xf32> -> vector<2x128xf32>
    %c6_76 = arith.constant 6 : index
    %c0_77 = arith.constant 0 : index
    %c0_78 = arith.constant 0 : index
    %209 = vector.load %arg2[%c6_76, %c0_77, %c0_78] : memref<7x2x128xf32, #tpu.memory_space<vmem>>, vector<1x2x128xf32>
    %210 = vector.shape_cast %209 : vector<1x2x128xf32> to vector<2x128xf32>
    %211 = vector.extract_strided_slice %210 {offsets = [0, 0], sizes = [1, 128], strides = [1, 1]} : vector<2x128xf32> to vector<1x128xf32>
    %212 = vector.broadcast %211 : vector<1x128xf32> to vector<2x128xf32>
    %213 = arith.addf %208, %212 : vector<2x128xf32>
    %c0_79 = arith.constant 0 : index
    %c0_80 = arith.constant 0 : index
    %214 = vector.load %arg3[%c0_79, %c0_80] : memref<2x128xf32, #tpu.memory_space<vmem>>, vector<2x128xf32>
    tpu.vector_store %arg3[%c0_79, %c0_80], %213 {strides = array<i32>} : memref<2x128xf32, #tpu.memory_space<vmem>>, vector<2x128xf32>,
    return
  }
}

</mosaic_0001>

<bundles_post_ra>
// kernel: tpu_custom_call.1
= control target key start
LH: loop header
LB: loop body
LE: loop exit
PB: predicated region body
PF: predicated region fallthrough
CT: control target
= control target key end

     0   :  { %8 = vsyncpa [#allocation3], 0  ;;  %s1723_s0 = inlined_call_operand.hbm [shape: f32[2,128], index: 0, kind: input, shape index: {}]   ;;  %s1724_s1 = inlined_call_operand.hbm [shape: bf16[7,128,128], index: 1, kind: input, shape index: {}]   ;;  %s1725_s2 = inlined_call_operand.hbm [shape: f32[7,2,128], index: 2, kind: input, shape index: {}]   ;;  %s1726_s3 = inlined_call_operand.hbm [shape: f32[2,128], index: 3, kind: output, shape index: {}]  }
   0x1   :  { %9 = vsyncpa [#allocation6], 0 }
   0x2   :  { %10 = vsyncpa [#allocation4], 0  ;;  %s1546_s12 = smov [#allocation5]   ;;  %s1452_s16 = scalar_lea.hbm %s1724_s1, 7168 }
   0x3   :  { %s26_s13 = sshll.u32 %s1546_s12, 4  ;;  %p1453_p0 = scmp.ne.s32.totalorder %s1724_s1, %s1452_s16  ;;  %s27_s13 = int_to_ptr.vmem [resolvable:$true] %s26_s13 }
   0x4   :  { %p1456_p1 = scmp.lt.u32.totalorder %s1452_s16, %s1724_s1 }
   0x6   :  { %p1458_p2 = pnand %p1456_p1, %p1453_p0 }
   0x8   :  { %1461 = shalt.err (!%p1458_p2)
}
   0x9   :  { %s1462_s21 = scalar_lea.vmem %s27_s13, 7168  ;;  %p1467_p4 = scmp.lt.s32.totalorder %s27_s13, %s27_s13 }
   0xa   :  { %p1463_p3 = scmp.ne.s32.totalorder %s27_s13, %s1462_s21  ;;  %p1468_p5 = scmp.lt.s32.totalorder %s1462_s21, %s1462_s21 }
   0xc   :  { %p1469_p6 = por %p1468_p5, %p1467_p4 }
   0xe   :  { %p1470_p7 = pnand %p1469_p6, %p1463_p3 }
  0x10   :  { %1473 = shalt.err (!%p1470_p7)
}
  0x11   :  { %s1547_s22 = smov 64   ;;  %s1548_s23 = smov 4  }
  0x12   :  { %32 = dma.hbm_to_vmem [thread:$0]  %s1724_s1, 7168, %s27_s13, [#allocation6], %s1547_s22, %s1547_s22, %s1548_s23  }
  0x13   :  { %s1549_s26 = smov [#allocation2]   ;;  %s1550_s28 = smov [#allocation7]  }
  0x14   :  { %s17_s27 = sshll.u32 %s1549_s26, 4  ;;  %s38_s29 = sshll.u32 %s1550_s28, 4  ;;  %s18_s27 = int_to_ptr.vmem [resolvable:$true] %s17_s27  ;;  %s39_s29 = int_to_ptr.vmem [resolvable:$true] %s38_s29 }
  0x15   :  { %s1474_s5 = scalar_lea.hbm %s1723_s0, 32 }
  0x16   :  { %p1475_p8 = scmp.ne.s32.totalorder %s1723_s0, %s1474_s5  ;;  %p1478_p9 = scmp.lt.u32.totalorder %s1474_s5, %s1723_s0 }
  0x18   :  { %p1480_p10 = pnand %p1478_p9, %p1475_p8 }
  0x1a   :  { %1483 = shalt.err (!%p1480_p10)
}
  0x1b   :  { %s1484_s1 = scalar_lea.vmem %s18_s27, 32  ;;  %p1489_p12 = scmp.lt.s32.totalorder %s18_s27, %s18_s27 }
  0x1c   :  { %p1485_p11 = scmp.ne.s32.totalorder %s18_s27, %s1484_s1  ;;  %p1490_p13 = scmp.lt.s32.totalorder %s1484_s1, %s1484_s1 }
  0x1e   :  { %p1491_p0 = por %p1490_p13, %p1489_p12 }
  0x20   :  { %p1492_p1 = pnand %p1491_p0, %p1485_p11 }
  0x22   :  { %1495 = shalt.err (!%p1492_p1)
}
  0x23   :  { %20 = dma.hbm_to_vmem [thread:$0]  %s1723_s0, 32, %s18_s27, [#allocation3]  }
  0x24   :  { %s1496_s14 = scalar_lea.hbm %s1725_s2, 224 }
  0x25   :  { %p1497_p2 = scmp.ne.s32.totalorder %s1725_s2, %s1496_s14  ;;  %p1500_p3 = scmp.lt.u32.totalorder %s1496_s14, %s1725_s2 }
  0x27   :  { %p1502_p4 = pnand %p1500_p3, %p1497_p2 }
  0x29   :  { %1505 = shalt.err (!%p1502_p4)
}
  0x2a   :  { %s1506_s19 = scalar_lea.vmem %s39_s29, 224  ;;  %p1511_p6 = scmp.lt.s32.totalorder %s39_s29, %s39_s29 }
  0x2b   :  { %p1507_p5 = scmp.ne.s32.totalorder %s39_s29, %s1506_s19  ;;  %p1512_p7 = scmp.lt.s32.totalorder %s1506_s19, %s1506_s19 }
  0x2d   :  { %p1513_p8 = por %p1512_p7, %p1511_p6 }
  0x2f   :  { %p1514_p9 = pnand %p1513_p8, %p1507_p5 }
  0x31   :  { %1517 = shalt.err (!%p1514_p9)
}
  0x32   :  { %s1551_s0 = smov 32   ;;  %s1552_s20 = smov 2  }
  0x33   :  { %44 = dma.hbm_to_vmem [thread:$0]  %s1725_s2, 224, %s39_s29, [#allocation6], %s1551_s0, %s1551_s0, %s1552_s20  }
  0x34   :  { %1540 = dma.done.wait [#allocation3], 32  }
  0x35   :  { %1541 = vsyncadd [#allocation3], 4294967264 }
  0x36   :  { %1542 = dma.done.wait [#allocation6], 7392  }
  0x37   :  { %1543 = vsyncadd [#allocation6], 4294959904  ;;  %v1553_v0 = vmov 0.0   ;;  %vm1554_vm0 = vmmov 0   ;;  %v1360_v1 = vld [vmem:[#allocation5] sm:$0xff]   ;;  %v1361_v2 = vld [vmem:[#allocation5 + $0x8] sm:$0xff]   ;;  %v190_v42 = vlaneseq }
  0x38   :  { %1210 = vmatprep.subr.bf16.mxu0 %v1553_v0  ;;  %1226 = vmatprep.mubr.msk.bf16.mxu0 %vm1554_vm0, %v1553_v0  ;;  %v1362_v3 = vld [vmem:[#allocation5 + $0x10] sm:$0xff]   ;;  %v1363_v4 = vld [vmem:[#allocation5 + $0x18] sm:$0xff]   ;;  %v1364_v5 = vld [vmem:[#allocation5 + $0x20] sm:$0xff]   ;;  %vm161_vm1 = vcmask 1041408   ;;  %s1555_s2 = smov [#allocation8]  }
  0x39   :  { %1230 = vmatprep.subr.bf16.mxu1 %v1553_v0  ;;  %1246 = vmatprep.mubr.msk.bf16.mxu1 %vm1554_vm0, %v1553_v0  ;;  %v1365_v6 = vld [vmem:[#allocation5 + $0x28] sm:$0xff]   ;;  %v1366_v7 = vld [vmem:[#allocation5 + $0x30] sm:$0xff]   ;;  %v1367_v8 = vld [vmem:[#allocation5 + $0x38] sm:$0xff]   ;;  %v191_v43 = vshrl.u32 %v190_v42, 7  ;;  %s1075_s23 = sshll.u32 %s1555_s2, 4  ;;  %s1076_s23 = int_to_ptr.vmem [resolvable:$true] %s1075_s23 }
  0x3a   :  { %1211 = vmatpush3.bf16.msra.mxu0 %v1360_v1  ;;  %v55_v9 = vld [vmem:[#allocation2] sm:$0x3]  ;;  %v1368_v11 = vld [vmem:[#allocation5 + $0x40] sm:$0xff]   ;;  %v1369_v12 = vld [vmem:[#allocation5 + $0x48] sm:$0xff]   ;;  %s1518_s24 = scalar_lea.vmem %s1076_s23, 32  ;;  %p1523_p11 = scmp.lt.s32.totalorder %s1076_s23, %s1076_s23 }
  0x3b   :  { %1212 = vmatprep.subr.bf16.mxu0 %v1553_v0  ;;  %v56_v10 = vpack.c.bf16 %v55_v9, %v55_v9  ;;  %1231 = vmatpush3.bf16.msra.mxu1 %v1368_v11  ;;  %v1370_v13 = vld [vmem:[#allocation5 + $0x50] sm:$0xff]   ;;  %v1371_v14 = vld [vmem:[#allocation5 + $0x58] sm:$0xff]   ;;  %v1372_v15 = vld [vmem:[#allocation5 + $0x60] sm:$0xff]   ;;  %v1638_v47 = vsub.s32 0, %v191_v43  ;;  %v1641_v51 = vsub.s32 1, %v191_v43  ;;  %p1519_p10 = scmp.ne.s32.totalorder %s1076_s23, %s1518_s24  ;;  %p1524_p12 = scmp.lt.s32.totalorder %s1518_s24, %s1518_s24 }
  0x3c   :  { %1232 = vmatprep.subr.bf16.mxu1 %v1553_v0  ;;  %v1373_v16 = vld [vmem:[#allocation5 + $0x68] sm:$0xff]   ;;  %v1374_v17 = vld [vmem:[#allocation5 + $0x70] sm:$0xff]   ;;  %v1375_v18 = vld [vmem:[#allocation5 + $0x78] sm:$0xff]  }
  0x3d   :  { %v181_v44 = vld [vmem:[#allocation7] sm:$0x3]  ;;  %v1377_v62 = vld [vmem:[#allocation5 + $0x88] sm:$0xff]   ;;  %v1378_v63 = vld [vmem:[#allocation5 + $0x90] sm:$0xff]   ;;  %p1525_p13 = por %p1524_p12, %p1523_p11 }
  0x3e   :  { %1213 = vmatpush3.bf16.msra.mxu0 %v1361_v2  ;;  %v1376_v61 = vld [vmem:[#allocation5 + $0x80] sm:$0xff]   ;;  %v1379_v1 = vld [vmem:[#allocation5 + $0x98] sm:$0xff]  }
  0x3f   :  { %1214 = vmatprep.subr.bf16.mxu0 %v1553_v0  ;;  %1233 = vmatpush3.bf16.msra.mxu1 %v1369_v12  ;;  %v1380_v2 = vld [vmem:[#allocation5 + $0xa0] sm:$0xff]   ;;  %p1526_p0 = pnand %p1525_p13, %p1519_p10 }
  0x40   :  { %1234 = vmatprep.subr.bf16.mxu1 %v1553_v0 }
  0x42   :  { %1215 = vmatpush3.bf16.msra.mxu0 %v1362_v3  ;;  %v1381_v3 = vld [vmem:[#allocation5 + $0xa8] sm:$0xff]  }
  0x43   :  { %1216 = vmatprep.subr.bf16.mxu0 %v1553_v0  ;;  %1235 = vmatpush3.bf16.msra.mxu1 %v1370_v13 }
  0x44   :  { %1236 = vmatprep.subr.bf16.mxu1 %v1553_v0 }
  0x46   :  { %1217 = vmatpush3.bf16.msra.mxu0 %v1363_v4  ;;  %v1382_v4 = vld [vmem:[#allocation5 + $0xb0] sm:$0xff]  }
  0x47   :  { %1218 = vmatprep.subr.bf16.mxu0 %v1553_v0  ;;  %1237 = vmatpush3.bf16.msra.mxu1 %v1371_v14 }
  0x48   :  { %1238 = vmatprep.subr.bf16.mxu1 %v1553_v0 }
  0x4a   :  { %1219 = vmatpush3.bf16.msra.mxu0 %v1364_v5  ;;  %v1383_v5 = vld [vmem:[#allocation5 + $0xb8] sm:$0xff]  }
  0x4b   :  { %1220 = vmatprep.subr.bf16.mxu0 %v1553_v0  ;;  %1239 = vmatpush3.bf16.msra.mxu1 %v1372_v15 }
  0x4c   :  { %1240 = vmatprep.subr.bf16.mxu1 %v1553_v0 }
  0x4e   :  { %1221 = vmatpush3.bf16.msra.mxu0 %v1365_v6 }
  0x4f   :  { %1222 = vmatprep.subr.bf16.mxu0 %v1553_v0  ;;  %1241 = vmatpush3.bf16.msra.mxu1 %v1373_v16 }
  0x50   :  { %1242 = vmatprep.subr.bf16.mxu1 %v1553_v0 }
  0x52   :  { %1223 = vmatpush3.bf16.msra.mxu0 %v1366_v7 }
  0x53   :  { %1224 = vmatprep.subr.bf16.mxu0 %v1553_v0  ;;  %1243 = vmatpush3.bf16.msra.mxu1 %v1374_v17 }
  0x54   :  { %1244 = vmatprep.subr.bf16.mxu1 %v1553_v0 }
  0x56   :  { %1225 = vmatpush3.bf16.msra.mxu0 %v1367_v8 }
  0x57   :  { %1250 = vmatprep.subr.bf16.mxu0 %v1553_v0  ;;  %1245 = vmatpush3.bf16.msra.mxu1 %v1375_v18 }
  0x58   :  { %1270 = vmatprep.subr.bf16.mxu1 %v1553_v0 }
  0x59   :  { %1227 = vmatmul.mubr.bf16.vlgmr.msra.gmra.mrb[0].mxu0 %v56_v10 }
  0x5a   :  { %1266 = vmatprep.mubr.msk.bf16.mxu0 %vm1554_vm0, %v1553_v0  ;;  %1251 = vmatpush3.bf16.msra.mxu0 %v1376_v61 }
  0x5b   :  { %1252 = vmatprep.subr.bf16.mxu0 %v1553_v0 }
  0x5e   :  { %1253 = vmatpush3.bf16.msra.mxu0 %v1377_v62 }
  0x5f   :  { %1254 = vmatprep.subr.bf16.mxu0 %v1553_v0 }
  0x62   :  { %1255 = vmatpush3.bf16.msra.mxu0 %v1378_v63 }
  0x63   :  { %1256 = vmatprep.subr.bf16.mxu0 %v1553_v0 }
  0x66   :  { %1257 = vmatpush3.bf16.msra.mxu0 %v1379_v1 }
  0x67   :  { %1258 = vmatprep.subr.bf16.mxu0 %v1553_v0 }
  0x6a   :  { %1259 = vmatpush3.bf16.msra.mxu0 %v1380_v2 }
  0x6b   :  { %1260 = vmatprep.subr.bf16.mxu0 %v1553_v0 }
  0x6e   :  { %1261 = vmatpush3.bf16.msra.mxu0 %v1381_v3 }
  0x6f   :  { %1262 = vmatprep.subr.bf16.mxu0 %v1553_v0 }
  0x72   :  { %1263 = vmatpush3.bf16.msra.mxu0 %v1382_v4 }
  0x73   :  { %1264 = vmatprep.subr.bf16.mxu0 %v1553_v0 }
  0x76   :  { %1265 = vmatpush3.bf16.msra.mxu0 %v1383_v5 }
  0x77   :  { %1290 = vmatprep.subr.bf16.mxu0 %v1553_v0 }
 0x12c   :  { %v155_v19 = vpop.f32.mrb[0].mxu0 }
 0x12d   :  { %v162_v20 = vsel %vm161_vm1, %v155_v19, 0.0  ;;  %v1228_v21 = vpop.f32.mrb[1].mxu0 }
 0x12e   :  { %v163_v22 = vrot.slane %v162_v20, 4  ;;  %v158_v23 = vpop.f32.mrb[2].mxu0 }
 0x12f   :  { %v1229_v24 = vpop.f32.mrb[3].mxu0 }
 0x130   :  { %v164_v25 = vadd.f32 %v163_v22, %v162_v20 }
 0x132   :  { %v165_v26 = vrot.slane %v164_v25, 2 }
 0x134   :  { %v166_v27 = vadd.f32 %v165_v26, %v164_v25 }
 0x136   :  { %v167_v28 = vrot.slane %v166_v27, 1 }
 0x138   :  { %v168_v29 = vadd.f32 %v167_v28, %v166_v27 }
 0x13a   :  { %v170_v30 = vmul.f32 0.5, %v168_v29  ;;  %v331_v29 = vld [vmem:[#allocation7 + $0x2] sm:$0x3] }
 0x13c   :  { %v171_v31 = vsub.f32 %v155_v19, %v170_v30 }
 0x13e   :  { %v172_v32 = vmul.f32 %v171_v31, %v171_v31 }
 0x140   :  { %v173_v33 = vsel %vm161_vm1, %v172_v32, 0.0 }
 0x141   :  { %v174_v34 = vrot.slane %v173_v33, 4 }
 0x143   :  { %v175_v35 = vadd.f32 %v174_v34, %v173_v33 }
 0x145   :  { %v176_v36 = vrot.slane %v175_v35, 2 }
 0x147   :  { %v177_v37 = vadd.f32 %v176_v36, %v175_v35 }
 0x149   :  { %v178_v38 = vrot.slane %v177_v37, 1 }
 0x14b   :  { %v179_v39 = vadd.f32 %v178_v38, %v177_v37 }
 0x14d   :  { %v180_v40 = vmul.f32 0.5, %v179_v39 }
 0x14f   :  { %v182_v41 = vadd.f32 1e-05, %v180_v40 }
 0x151   :  { %1416 = vrsqrt.f32 %v182_v41 }
 0x15b   :  { %v1417_v45 = vpop.eup %1416 }
 0x15c   :  { %v184_v46 = vmul.f32 %v1417_v45, %v181_v44  ;;  %v1385_v45 = vld [vmem:[#allocation5 + $0xc8] sm:$0xff]  }
 0x15e   :  { %v185_v48 = vmul.f32 %v184_v46, %v170_v30  ;;  %v193_v50 = vrot.slane %v184_v46, %v1638_v47  ;;  %v1386_v46 = vld [vmem:[#allocation5 + $0xd0] sm:$0xff]  }
 0x160   :  { %v187_v49 = vrot.slane %v185_v48, 7  ;;  %v194_v53 = vmul.f32 %v193_v50, %v155_v19  ;;  %v1387_v48 = vld [vmem:[#allocation5 + $0xd8] sm:$0xff]   ;;  %v1389_v50 = vld [vmem:[#allocation5 + $0xe8] sm:$0xff]  }
 0x162   :  { %v189_v52 = vsub.f32 %v181_v44, %v187_v49  ;;  %v1384_v44 = vld [vmem:[#allocation5 + $0xc0] sm:$0xff]  }
 0x163   :  { %v1388_v49 = vld [vmem:[#allocation5 + $0xe0] sm:$0xff]  }
 0x164   :  { %v198_v54 = vrot.slane %v189_v52, %v1641_v51  ;;  %v1390_v52 = vld [vmem:[#allocation5 + $0xf0] sm:$0xff]  }
 0x166   :  { %v199_v55 = vadd.f32 %v198_v54, %v194_v53  ;;  %v1391_v53 = vld [vmem:[#allocation5 + $0xf8] sm:$0xff]  }
 0x168   :  { %v1093_v56 = vmul.f32 -1.442695, %v199_v55 }
 0x16a   :  { %1418 = vpow2.f32 %v1093_v56 }
 0x174   :  { %v1419_v57 = vpop.eup %1418 }
 0x175   :  { %v203_v58 = vadd.f32 1.0, %v1419_v57 }
 0x177   :  { %1420 = vrcp.f32 %v203_v58 }
 0x181   :  { %v1421_v59 = vpop.eup %1420 }
 0x182   :  { %v206_v60 = vpack.c.bf16 %v1421_v59, %v1421_v59 }
 0x184   :  { %1247 = vmatmul.mubr.bf16.vlgmr.msra.gmra.mrb[0].mxu1 %v206_v60 }
 0x185   :  { %1286 = vmatprep.mubr.msk.bf16.mxu1 %vm1554_vm0, %v1553_v0  ;;  %1271 = vmatpush3.bf16.msra.mxu1 %v1384_v44 }
 0x186   :  { %1272 = vmatprep.subr.bf16.mxu1 %v1553_v0 }
 0x189   :  { %1273 = vmatpush3.bf16.msra.mxu1 %v1385_v45 }
 0x18a   :  { %1274 = vmatprep.subr.bf16.mxu1 %v1553_v0 }
 0x18d   :  { %1275 = vmatpush3.bf16.msra.mxu1 %v1386_v46 }
 0x18e   :  { %1276 = vmatprep.subr.bf16.mxu1 %v1553_v0 }
 0x191   :  { %1277 = vmatpush3.bf16.msra.mxu1 %v1387_v48 }
 0x192   :  { %1278 = vmatprep.subr.bf16.mxu1 %v1553_v0 }
 0x195   :  { %1279 = vmatpush3.bf16.msra.mxu1 %v1388_v49 }
 0x196   :  { %1280 = vmatprep.subr.bf16.mxu1 %v1553_v0 }
 0x199   :  { %1281 = vmatpush3.bf16.msra.mxu1 %v1389_v50 }
 0x19a   :  { %1282 = vmatprep.subr.bf16.mxu1 %v1553_v0 }
 0x19d   :  { %1283 = vmatpush3.bf16.msra.mxu1 %v1390_v52 }
 0x19e   :  { %1284 = vmatprep.subr.bf16.mxu1 %v1553_v0 }
 0x1a1   :  { %1285 = vmatpush3.bf16.msra.mxu1 %v1391_v53 }
 0x1a2   :  { %1310 = vmatprep.subr.bf16.mxu1 %v1553_v0 }
 0x257   :  { %v306_v6 = vpop.f32.mrb[0].mxu1 }
 0x258   :  { %v312_v7 = vsel %vm161_vm1, %v306_v6, 0.0  ;;  %v1248_v8 = vpop.f32.mrb[1].mxu1 }
 0x259   :  { %v313_v9 = vrot.slane %v312_v7, 4  ;;  %v309_v10 = vpop.f32.mrb[2].mxu1 }
 0x25a   :  { %v1249_v11 = vpop.f32.mrb[3].mxu1 }
 0x25b   :  { %v314_v12 = vadd.f32 %v313_v9, %v312_v7 }
 0x25d   :  { %v315_v13 = vrot.slane %v314_v12, 2 }
 0x25f   :  { %v316_v14 = vadd.f32 %v315_v13, %v314_v12 }
 0x261   :  { %v317_v15 = vrot.slane %v316_v14, 1 }
 0x263   :  { %v318_v16 = vadd.f32 %v317_v15, %v316_v14  ;;  %v481_v14 = vld [vmem:[#allocation7 + $0x4] sm:$0x3] }
 0x265   :  { %v319_v17 = vmul.f32 0.5, %v318_v16 }
 0x267   :  { %v320_v18 = vsub.f32 %v306_v6, %v319_v17 }
 0x269   :  { %v321_v19 = vmul.f32 %v320_v18, %v320_v18 }
 0x26b   :  { %v322_v20 = vsel %vm161_vm1, %v321_v19, 0.0 }
 0x26c   :  { %v323_v21 = vrot.slane %v322_v20, 4 }
 0x26e   :  { %v324_v22 = vadd.f32 %v323_v21, %v322_v20 }
 0x270   :  { %v325_v23 = vrot.slane %v324_v22, 2 }
 0x272   :  { %v326_v24 = vadd.f32 %v325_v23, %v324_v22 }
 0x274   :  { %v327_v25 = vrot.slane %v326_v24, 1 }
 0x276   :  { %v328_v26 = vadd.f32 %v327_v25, %v326_v24 }
 0x278   :  { %v329_v27 = vmul.f32 0.5, %v328_v26 }
 0x27a   :  { %v332_v28 = vadd.f32 1e-05, %v329_v27 }
 0x27c   :  { %1422 = vrsqrt.f32 %v332_v28 }
 0x286   :  { %v1423_v30 = vpop.eup %1422 }
 0x287   :  { %v334_v31 = vmul.f32 %v1423_v30, %v331_v29  ;;  %v1393_v30 = vld [vmem:[#allocation5 + $0x108] sm:$0xff]  }
 0x289   :  { %v335_v32 = vmul.f32 %v334_v31, %v319_v17  ;;  %v343_v34 = vrot.slane %v334_v31, %v1638_v47  ;;  %v1394_v31 = vld [vmem:[#allocation5 + $0x110] sm:$0xff]  }
 0x28b   :  { %v337_v33 = vrot.slane %v335_v32, 7  ;;  %v344_v36 = vmul.f32 %v343_v34, %v306_v6  ;;  %v1395_v32 = vld [vmem:[#allocation5 + $0x118] sm:$0xff]   ;;  %v1397_v34 = vld [vmem:[#allocation5 + $0x128] sm:$0xff]  }
 0x28d   :  { %v339_v35 = vsub.f32 %v331_v29, %v337_v33  ;;  %v1392_v29 = vld [vmem:[#allocation5 + $0x100] sm:$0xff]  }
 0x28e   :  { %v1396_v33 = vld [vmem:[#allocation5 + $0x120] sm:$0xff]  }
 0x28f   :  { %v348_v37 = vrot.slane %v339_v35, %v1641_v51  ;;  %v1398_v35 = vld [vmem:[#allocation5 + $0x130] sm:$0xff]  }
 0x291   :  { %v349_v38 = vadd.f32 %v348_v37, %v344_v36  ;;  %v1399_v36 = vld [vmem:[#allocation5 + $0x138] sm:$0xff]  }
 0x293   :  { %v1102_v39 = vmul.f32 -1.442695, %v349_v38 }
 0x295   :  { %1424 = vpow2.f32 %v1102_v39 }
 0x29f   :  { %v1425_v40 = vpop.eup %1424 }
 0x2a0   :  { %v353_v41 = vadd.f32 1.0, %v1425_v40 }
 0x2a2   :  { %1426 = vrcp.f32 %v353_v41 }
 0x2ac   :  { %v1427_v42 = vpop.eup %1426 }
 0x2ad   :  { %v356_v43 = vpack.c.bf16 %v1427_v42, %v1427_v42 }
 0x2af   :  { %1267 = vmatmul.mubr.bf16.vlgmr.msra.gmra.mrb[4].mxu0 %v356_v43 }
 0x2b0   :  { %1306 = vmatprep.mubr.msk.bf16.mxu0 %vm1554_vm0, %v1553_v0  ;;  %1291 = vmatpush3.bf16.msra.mxu0 %v1392_v29 }
 0x2b1   :  { %1292 = vmatprep.subr.bf16.mxu0 %v1553_v0 }
 0x2b4   :  { %1293 = vmatpush3.bf16.msra.mxu0 %v1393_v30 }
 0x2b5   :  { %1294 = vmatprep.subr.bf16.mxu0 %v1553_v0 }
 0x2b8   :  { %1295 = vmatpush3.bf16.msra.mxu0 %v1394_v31 }
 0x2b9   :  { %1296 = vmatprep.subr.bf16.mxu0 %v1553_v0 }
 0x2bc   :  { %1297 = vmatpush3.bf16.msra.mxu0 %v1395_v32 }
 0x2bd   :  { %1298 = vmatprep.subr.bf16.mxu0 %v1553_v0 }
 0x2c0   :  { %1299 = vmatpush3.bf16.msra.mxu0 %v1396_v33 }
 0x2c1   :  { %1300 = vmatprep.subr.bf16.mxu0 %v1553_v0 }
 0x2c4   :  { %1301 = vmatpush3.bf16.msra.mxu0 %v1397_v34 }
 0x2c5   :  { %1302 = vmatprep.subr.bf16.mxu0 %v1553_v0 }
 0x2c8   :  { %1303 = vmatpush3.bf16.msra.mxu0 %v1398_v35 }
 0x2c9   :  { %1304 = vmatprep.subr.bf16.mxu0 %v1553_v0 }
 0x2cc   :  { %1305 = vmatpush3.bf16.msra.mxu0 %v1399_v36 }
 0x2cd   :  { %1330 = vmatprep.subr.bf16.mxu0 %v1553_v0 }
 0x382   :  { %v456_v54 = vpop.f32.mrb[4].mxu0 }
 0x383   :  { %v462_v55 = vsel %vm161_vm1, %v456_v54, 0.0  ;;  %v1268_v56 = vpop.f32.mrb[5].mxu0 }
 0x384   :  { %v463_v57 = vrot.slane %v462_v55, 4  ;;  %v459_v58 = vpop.f32.mrb[6].mxu0 }
 0x385   :  { %v1269_v59 = vpop.f32.mrb[7].mxu0 }
 0x386   :  { %v464_v60 = vadd.f32 %v463_v57, %v462_v55 }
 0x388   :  { %v465_v61 = vrot.slane %v464_v60, 2 }
 0x38a   :  { %v466_v62 = vadd.f32 %v465_v61, %v464_v60 }
 0x38c   :  { %v467_v63 = vrot.slane %v466_v62, 1 }
 0x38e   :  { %v468_v1 = vadd.f32 %v467_v63, %v466_v62  ;;  %v631_v62 = vld [vmem:[#allocation7 + $0x6] sm:$0x3] }
 0x390   :  { %v469_v2 = vmul.f32 0.5, %v468_v1 }
 0x392   :  { %v470_v3 = vsub.f32 %v456_v54, %v469_v2 }
 0x394   :  { %v471_v4 = vmul.f32 %v470_v3, %v470_v3 }
 0x396   :  { %v472_v5 = vsel %vm161_vm1, %v471_v4, 0.0 }
 0x397   :  { %v473_v6 = vrot.slane %v472_v5, 4 }
 0x399   :  { %v474_v7 = vadd.f32 %v473_v6, %v472_v5 }
 0x39b   :  { %v475_v8 = vrot.slane %v474_v7, 2 }
 0x39d   :  { %v476_v9 = vadd.f32 %v475_v8, %v474_v7 }
 0x39f   :  { %v477_v10 = vrot.slane %v476_v9, 1 }
 0x3a1   :  { %v478_v11 = vadd.f32 %v477_v10, %v476_v9 }
 0x3a3   :  { %v479_v12 = vmul.f32 0.5, %v478_v11 }
 0x3a5   :  { %v482_v13 = vadd.f32 1e-05, %v479_v12 }
 0x3a7   :  { %1428 = vrsqrt.f32 %v482_v13 }
 0x3b1   :  { %v1429_v15 = vpop.eup %1428 }
 0x3b2   :  { %v484_v16 = vmul.f32 %v1429_v15, %v481_v14  ;;  %v1401_v15 = vld [vmem:[#allocation5 + $0x148] sm:$0xff]  }
 0x3b4   :  { %v485_v17 = vmul.f32 %v484_v16, %v469_v2  ;;  %v493_v19 = vrot.slane %v484_v16, %v1638_v47  ;;  %v1402_v16 = vld [vmem:[#allocation5 + $0x150] sm:$0xff]  }
 0x3b6   :  { %v487_v18 = vrot.slane %v485_v17, 7  ;;  %v494_v21 = vmul.f32 %v493_v19, %v456_v54  ;;  %v1403_v17 = vld [vmem:[#allocation5 + $0x158] sm:$0xff]   ;;  %v1405_v19 = vld [vmem:[#allocation5 + $0x168] sm:$0xff]  }
 0x3b8   :  { %v489_v20 = vsub.f32 %v481_v14, %v487_v18  ;;  %v1400_v14 = vld [vmem:[#allocation5 + $0x140] sm:$0xff]  }
 0x3b9   :  { %v1404_v18 = vld [vmem:[#allocation5 + $0x160] sm:$0xff]  }
 0x3ba   :  { %v498_v22 = vrot.slane %v489_v20, %v1641_v51  ;;  %v1406_v20 = vld [vmem:[#allocation5 + $0x170] sm:$0xff]  }
 0x3bc   :  { %v499_v23 = vadd.f32 %v498_v22, %v494_v21  ;;  %v1407_v21 = vld [vmem:[#allocation5 + $0x178] sm:$0xff]  }
 0x3be   :  { %v1111_v24 = vmul.f32 -1.442695, %v499_v23 }
 0x3c0   :  { %1430 = vpow2.f32 %v1111_v24 }
 0x3ca   :  { %v1431_v25 = vpop.eup %1430 }
 0x3cb   :  { %v503_v26 = vadd.f32 1.0, %v1431_v25 }
 0x3cd   :  { %1432 = vrcp.f32 %v503_v26 }
 0x3d7   :  { %v1433_v27 = vpop.eup %1432 }
 0x3d8   :  { %v506_v28 = vpack.c.bf16 %v1433_v27, %v1433_v27 }
 0x3da   :  { %1287 = vmatmul.mubr.bf16.vlgmr.msra.gmra.mrb[4].mxu1 %v506_v28 }
 0x3db   :  { %1326 = vmatprep.mubr.msk.bf16.mxu1 %vm1554_vm0, %v1553_v0  ;;  %1311 = vmatpush3.bf16.msra.mxu1 %v1400_v14 }
 0x3dc   :  { %1312 = vmatprep.subr.bf16.mxu1 %v1553_v0 }
 0x3df   :  { %1313 = vmatpush3.bf16.msra.mxu1 %v1401_v15 }
 0x3e0   :  { %1314 = vmatprep.subr.bf16.mxu1 %v1553_v0 }
 0x3e3   :  { %1315 = vmatpush3.bf16.msra.mxu1 %v1402_v16 }
 0x3e4   :  { %1316 = vmatprep.subr.bf16.mxu1 %v1553_v0 }
 0x3e7   :  { %1317 = vmatpush3.bf16.msra.mxu1 %v1403_v17 }
 0x3e8   :  { %1318 = vmatprep.subr.bf16.mxu1 %v1553_v0 }
 0x3eb   :  { %1319 = vmatpush3.bf16.msra.mxu1 %v1404_v18 }
 0x3ec   :  { %1320 = vmatprep.subr.bf16.mxu1 %v1553_v0 }
 0x3ef   :  { %1321 = vmatpush3.bf16.msra.mxu1 %v1405_v19 }
 0x3f0   :  { %1322 = vmatprep.subr.bf16.mxu1 %v1553_v0 }
 0x3f3   :  { %1323 = vmatpush3.bf16.msra.mxu1 %v1406_v20 }
 0x3f4   :  { %1324 = vmatprep.subr.bf16.mxu1 %v1553_v0 }
 0x3f7   :  { %1325 = vmatpush3.bf16.msra.mxu1 %v1407_v21 }
 0x4ad   :  { %v606_v37 = vpop.f32.mrb[4].mxu1 }
 0x4ae   :  { %v612_v38 = vsel %vm161_vm1, %v606_v37, 0.0  ;;  %v1288_v39 = vpop.f32.mrb[5].mxu1 }
 0x4af   :  { %v613_v40 = vrot.slane %v612_v38, 4  ;;  %v609_v41 = vpop.f32.mrb[6].mxu1 }
 0x4b0   :  { %v1289_v42 = vpop.f32.mrb[7].mxu1 }
 0x4b1   :  { %v614_v43 = vadd.f32 %v613_v40, %v612_v38 }
 0x4b3   :  { %v615_v44 = vrot.slane %v614_v43, 2 }
 0x4b5   :  { %v616_v45 = vadd.f32 %v615_v44, %v614_v43 }
 0x4b7   :  { %v617_v46 = vrot.slane %v616_v45, 1 }
 0x4b9   :  { %v618_v48 = vadd.f32 %v617_v46, %v616_v45  ;;  %v781_v45 = vld [vmem:[#allocation7 + $0x8] sm:$0x3] }
 0x4bb   :  { %v619_v49 = vmul.f32 0.5, %v618_v48 }
 0x4bd   :  { %v620_v50 = vsub.f32 %v606_v37, %v619_v49 }
 0x4bf   :  { %v621_v52 = vmul.f32 %v620_v50, %v620_v50 }
 0x4c1   :  { %v622_v53 = vsel %vm161_vm1, %v621_v52, 0.0 }
 0x4c2   :  { %v623_v54 = vrot.slane %v622_v53, 4 }
 0x4c4   :  { %v624_v55 = vadd.f32 %v623_v54, %v622_v53 }
 0x4c6   :  { %v625_v56 = vrot.slane %v624_v55, 2 }
 0x4c8   :  { %v626_v57 = vadd.f32 %v625_v56, %v624_v55 }
 0x4ca   :  { %v627_v58 = vrot.slane %v626_v57, 1 }
 0x4cc   :  { %v628_v59 = vadd.f32 %v627_v58, %v626_v57 }
 0x4ce   :  { %v629_v60 = vmul.f32 0.5, %v628_v59 }
 0x4d0   :  { %v632_v61 = vadd.f32 1e-05, %v629_v60 }
 0x4d2   :  { %1434 = vrsqrt.f32 %v632_v61 }
 0x4dc   :  { %v1435_v63 = vpop.eup %1434 }
 0x4dd   :  { %v634_v1 = vmul.f32 %v1435_v63, %v631_v62  ;;  %v1409_v63 = vld [vmem:[#allocation5 + $0x188] sm:$0xff]  }
 0x4df   :  { %v635_v2 = vmul.f32 %v634_v1, %v619_v49  ;;  %v643_v4 = vrot.slane %v634_v1, %v1638_v47  ;;  %v1410_v1 = vld [vmem:[#allocation5 + $0x190] sm:$0xff]  }
 0x4e1   :  { %v637_v3 = vrot.slane %v635_v2, 7  ;;  %v644_v6 = vmul.f32 %v643_v4, %v606_v37  ;;  %v1411_v2 = vld [vmem:[#allocation5 + $0x198] sm:$0xff]   ;;  %v1413_v4 = vld [vmem:[#allocation5 + $0x1a8] sm:$0xff]  }
 0x4e3   :  { %v639_v5 = vsub.f32 %v631_v62, %v637_v3  ;;  %v1408_v62 = vld [vmem:[#allocation5 + $0x180] sm:$0xff]  }
 0x4e4   :  { %v1412_v3 = vld [vmem:[#allocation5 + $0x1a0] sm:$0xff]  }
 0x4e5   :  { %v648_v7 = vrot.slane %v639_v5, %v1641_v51  ;;  %v1414_v5 = vld [vmem:[#allocation5 + $0x1b0] sm:$0xff]  }
 0x4e7   :  { %v649_v8 = vadd.f32 %v648_v7, %v644_v6  ;;  %v1415_v6 = vld [vmem:[#allocation5 + $0x1b8] sm:$0xff]  }
 0x4e9   :  { %v1120_v9 = vmul.f32 -1.442695, %v649_v8 }
 0x4eb   :  { %1436 = vpow2.f32 %v1120_v9 }
 0x4f5   :  { %v1437_v10 = vpop.eup %1436 }
 0x4f6   :  { %v653_v11 = vadd.f32 1.0, %v1437_v10 }
 0x4f8   :  { %1438 = vrcp.f32 %v653_v11 }
 0x502   :  { %v1439_v12 = vpop.eup %1438 }
 0x503   :  { %v656_v13 = vpack.c.bf16 %v1439_v12, %v1439_v12 }
 0x505   :  { %1307 = vmatmul.mubr.bf16.vlgmr.msra.gmra.mrb[8].mxu0 %v656_v13 }
 0x506   :  { %1346 = vmatprep.mubr.msk.bf16.mxu0 %vm1554_vm0, %v1553_v0  ;;  %1331 = vmatpush3.bf16.msra.mxu0 %v1408_v62 }
 0x507   :  { %1332 = vmatprep.subr.bf16.mxu0 %v1553_v0 }
 0x50a   :  { %1333 = vmatpush3.bf16.msra.mxu0 %v1409_v63 }
 0x50b   :  { %1334 = vmatprep.subr.bf16.mxu0 %v1553_v0 }
 0x50e   :  { %1335 = vmatpush3.bf16.msra.mxu0 %v1410_v1 }
 0x50f   :  { %1336 = vmatprep.subr.bf16.mxu0 %v1553_v0 }
 0x512   :  { %1337 = vmatpush3.bf16.msra.mxu0 %v1411_v2 }
 0x513   :  { %1338 = vmatprep.subr.bf16.mxu0 %v1553_v0 }
 0x516   :  { %1339 = vmatpush3.bf16.msra.mxu0 %v1412_v3 }
 0x517   :  { %1340 = vmatprep.subr.bf16.mxu0 %v1553_v0 }
 0x51a   :  { %1341 = vmatpush3.bf16.msra.mxu0 %v1413_v4 }
 0x51b   :  { %1342 = vmatprep.subr.bf16.mxu0 %v1553_v0 }
 0x51e   :  { %1343 = vmatpush3.bf16.msra.mxu0 %v1414_v5 }
 0x51f   :  { %1344 = vmatprep.subr.bf16.mxu0 %v1553_v0 }
 0x522   :  { %1345 = vmatpush3.bf16.msra.mxu0 %v1415_v6 }
 0x5d8   :  { %v756_v22 = vpop.f32.mrb[8].mxu0 }
 0x5d9   :  { %v762_v23 = vsel %vm161_vm1, %v756_v22, 0.0  ;;  %v1308_v24 = vpop.f32.mrb[9].mxu0 }
 0x5da   :  { %v763_v25 = vrot.slane %v762_v23, 4  ;;  %v759_v26 = vpop.f32.mrb[10].mxu0 }
 0x5db   :  { %v1309_v27 = vpop.f32.mrb[11].mxu0 }
 0x5dc   :  { %v764_v28 = vadd.f32 %v763_v25, %v762_v23 }
 0x5de   :  { %v765_v29 = vrot.slane %v764_v28, 2 }
 0x5e0   :  { %v766_v30 = vadd.f32 %v765_v29, %v764_v28  ;;  %v931_v29 = vld [vmem:[#allocation7 + $0xa] sm:$0x3] }
 0x5e2   :  { %v767_v31 = vrot.slane %v766_v30, 1 }
 0x5e4   :  { %v768_v32 = vadd.f32 %v767_v31, %v766_v30 }
 0x5e6   :  { %v769_v33 = vmul.f32 0.5, %v768_v32 }
 0x5e8   :  { %v770_v34 = vsub.f32 %v756_v22, %v769_v33 }
 0x5ea   :  { %v771_v35 = vmul.f32 %v770_v34, %v770_v34 }
 0x5ec   :  { %v772_v36 = vsel %vm161_vm1, %v771_v35, 0.0 }
 0x5ed   :  { %v773_v37 = vrot.slane %v772_v36, 4 }
 0x5ef   :  { %v774_v38 = vadd.f32 %v773_v37, %v772_v36 }
 0x5f1   :  { %v775_v39 = vrot.slane %v774_v38, 2 }
 0x5f3   :  { %v776_v40 = vadd.f32 %v775_v39, %v774_v38 }
 0x5f5   :  { %v777_v41 = vrot.slane %v776_v40, 1 }
 0x5f7   :  { %v778_v42 = vadd.f32 %v777_v41, %v776_v40 }
 0x5f9   :  { %v779_v43 = vmul.f32 0.5, %v778_v42 }
 0x5fb   :  { %v782_v44 = vadd.f32 1e-05, %v779_v43 }
 0x5fd   :  { %1440 = vrsqrt.f32 %v782_v44  ;;  %v975_v44 = vld [vmem:[#allocation7 + $0xc] sm:$0x3] }
 0x607   :  { %v1441_v46 = vpop.eup %1440 }
 0x608   :  { %v784_v48 = vmul.f32 %v1441_v46, %v781_v45 }
 0x60a   :  { %v785_v49 = vmul.f32 %v784_v48, %v769_v33  ;;  %v793_v52 = vrot.slane %v784_v48, %v1638_v47 }
 0x60c   :  { %v787_v50 = vrot.slane %v785_v49, 7  ;;  %v794_v54 = vmul.f32 %v793_v52, %v756_v22 }
 0x60e   :  { %v789_v53 = vsub.f32 %v781_v45, %v787_v50  ;;  %v979_v45 = vrot.slane %v975_v44, %v1638_v47 }
 0x610   :  { %v798_v55 = vrot.slane %v789_v53, %v1641_v51 }
 0x612   :  { %v799_v56 = vadd.f32 %v798_v55, %v794_v54 }
 0x614   :  { %v1129_v57 = vmul.f32 -1.442695, %v799_v56 }
 0x616   :  { %1442 = vpow2.f32 %v1129_v57 }
 0x620   :  { %v1443_v58 = vpop.eup %1442 }
 0x621   :  { %v803_v59 = vadd.f32 1.0, %v1443_v58 }
 0x623   :  { %1444 = vrcp.f32 %v803_v59 }
 0x62d   :  { %v1445_v60 = vpop.eup %1444 }
 0x62e   :  { %v806_v61 = vpack.c.bf16 %v1445_v60, %v1445_v60 }
 0x630   :  { %1327 = vmatmul.mubr.bf16.vlgmr.msra.gmra.mrb[8].mxu1 %v806_v61 }
 0x703   :  { %v906_v7 = vpop.f32.mrb[8].mxu1 }
 0x704   :  { %v912_v8 = vsel %vm161_vm1, %v906_v7, 0.0  ;;  %v1328_v9 = vpop.f32.mrb[9].mxu1 }
 0x705   :  { %v913_v10 = vrot.slane %v912_v8, 4  ;;  %v909_v11 = vpop.f32.mrb[10].mxu1 }
 0x706   :  { %v1329_v12 = vpop.f32.mrb[11].mxu1 }
 0x707   :  { %v914_v13 = vadd.f32 %v913_v10, %v912_v8 }
 0x709   :  { %v915_v14 = vrot.slane %v914_v13, 2 }
 0x70b   :  { %v916_v15 = vadd.f32 %v915_v14, %v914_v13 }
 0x70d   :  { %v917_v16 = vrot.slane %v916_v15, 1 }
 0x70f   :  { %v918_v17 = vadd.f32 %v917_v16, %v916_v15 }
 0x711   :  { %v919_v18 = vmul.f32 0.5, %v918_v17 }
 0x713   :  { %v920_v19 = vsub.f32 %v906_v7, %v919_v18 }
 0x715   :  { %v921_v20 = vmul.f32 %v920_v19, %v920_v19 }
 0x717   :  { %v922_v21 = vsel %vm161_vm1, %v921_v20, 0.0 }
 0x718   :  { %v923_v22 = vrot.slane %v922_v21, 4 }
 0x71a   :  { %v924_v0 = vadd.f32 %v923_v22, %v922_v21 }
 0x71c   :  { %v925_v23 = vrot.slane %v924_v0, 2 }
 0x71e   :  { %v926_v24 = vadd.f32 %v925_v23, %v924_v0 }
 0x720   :  { %v927_v25 = vrot.slane %v926_v24, 1 }
 0x722   :  { %v928_v26 = vadd.f32 %v927_v25, %v926_v24 }
 0x724   :  { %v929_v27 = vmul.f32 0.5, %v928_v26 }
 0x726   :  { %v932_v28 = vadd.f32 1e-05, %v929_v27 }
 0x728   :  { %1446 = vrsqrt.f32 %v932_v28 }
 0x732   :  { %v1447_v30 = vpop.eup %1446 }
 0x733   :  { %v934_v31 = vmul.f32 %v1447_v30, %v931_v29 }
 0x735   :  { %v935_v32 = vmul.f32 %v934_v31, %v919_v18  ;;  %v943_v34 = vrot.slane %v934_v31, %v1638_v47 }
 0x737   :  { %v937_v33 = vrot.slane %v935_v32, 7  ;;  %v944_v36 = vmul.f32 %v943_v34, %v906_v7 }
 0x739   :  { %v939_v35 = vsub.f32 %v931_v29, %v937_v33 }
 0x73b   :  { %v948_v37 = vrot.slane %v939_v35, %v1641_v51 }
 0x73d   :  { %v949_v38 = vadd.f32 %v948_v37, %v944_v36 }
 0x73f   :  { %v1138_v39 = vmul.f32 -1.442695, %v949_v38 }
 0x741   :  { %1448 = vpow2.f32 %v1138_v39 }
 0x74b   :  { %v1449_v40 = vpop.eup %1448 }
 0x74c   :  { %v953_v41 = vadd.f32 1.0, %v1449_v40 }
 0x74e   :  { %1450 = vrcp.f32 %v953_v41 }
 0x758   :  { %v1451_v42 = vpop.eup %1450 }
 0x759   :  { %v956_v43 = vpack.c.bf16 %v1451_v42, %v1451_v42 }
 0x75b   :  { %1347 = vmatmul.mubr.bf16.vlgmr.msra.gmra.mrb[12].mxu0 %v956_v43 }
 0x82e   :  { %v1062_v46 = vpop.f32.mrb[12].mxu0 }
 0x82f   :  { %v1063_v48 = vadd.f32 %v1062_v46, %v979_v45  ;;  %v1348_v49 = vpop.f32.mrb[13].mxu0 }
 0x830   :  { %v1065_v50 = vpop.f32.mrb[14].mxu0 }
 0x831   :  { %1068 = vst [vmem:[#allocation8] sm:$0x3] %v1063_v48  ;;  %v1349_v51 = vpop.f32.mrb[15].mxu0 }
 0x832   :  { %1529 = shalt.err (!%p1526_p0)
}
 0x833   :  { %s1530_s27 = scalar_lea.hbm %s1726_s3, 32 }
 0x834   :  { %p1531_p1 = scmp.ne.s32.totalorder %s1726_s3, %s1530_s27  ;;  %p1534_p2 = scmp.lt.u32.totalorder %s1530_s27, %s1726_s3 }
 0x836   :  { %p1536_p3 = pnand %p1534_p2, %p1531_p1 }
 0x838   :  { %1539 = shalt.err (!%p1536_p3)
}
 0x839   :  { %1078 = dma.vmem_to_hbm [thread:$0]  %s1076_s23, 32, %s1726_s3, [#allocation4]  }
 0x83a   :  { %1544 = dma.done.wait [#allocation4], 32  }
 0x83b   :  { %1545 = vsyncadd [#allocation4], 4294967264 }
 0x83c   :  { %1082 = vsyncpa [#allocation3], 1 }
 0x83d   :  { %1083 = vsyncpa [#allocation6], 1 }
 0x83e   :  { %1084 = vsyncpa [#allocation4], 1 }

</bundles_post_ra>
